<compile_context>
chip_gen: v7x
topology: tpu7x:2x2x1
jax: 0.10.0
libtpu: 0.0.40
codegen_flags: <defaults>
</compile_context>

<pallas_src>
import functools

import jax
import jax.numpy as jnp
from jax.experimental import pallas as pl
from jax.experimental.pallas import tpu as pltpu


def _round_up(x, m):
    return ((x + m - 1) // m) * m


def mf_kernel(u_ref, i_ref, o_ref, *, mean):
    # u_ref / i_ref: (TB, D2) gathered rows with the bias columns folded in.
    # o_ref: (TB, 1).
    u = u_ref[...].astype(jnp.float32)
    v = i_ref[...].astype(jnp.float32)
    z = jnp.sum(u * v, axis=1, keepdims=True) + mean     # (TB, 1), includes b_u + b_i
    o_ref[...] = jax.nn.sigmoid(z)


def fold_bias_into_tables(user_emb, user_bias, item_emb, item_bias, dtype=None):
    """One-time fold so dot(U'[u], I'[i]) == dot(U[u], I[i]) + b_u[u] + b_i[i]."""
    dtype = dtype or user_emb.dtype
    nu, ni = user_emb.shape[0], item_emb.shape[0]
    U2 = jnp.concatenate(
        [user_emb, user_bias.reshape(nu, 1), jnp.ones((nu, 1), user_emb.dtype)],
        axis=1).astype(dtype)
    I2 = jnp.concatenate(
        [item_emb, jnp.ones((ni, 1), item_emb.dtype), item_bias.reshape(ni, 1)],
        axis=1).astype(dtype)
    return U2, I2


def _choose_tile(b8):
    # Single block for small/medium batches; otherwise 512-1024 rows per step
    # so per-step overhead is negligible, DMA chunks are large, and there are
    # >= 2 grid steps for the two v7x TensorCores.
    if b8 <= 1024:
        return b8
    return 1024 if b8 >= 2048 else 512


def mf_forward(fields, user_table, item_table, mean, *, min_pallas_batch=1024):
    """sigmoid(sum(U'[u] * I'[i], -1) + mean). Tables come from fold_bias_into_tables."""
    B = fields.shape[0]
    D2 = user_table.shape[1]
    uids = fields[:, 0].astype(jnp.int32)
    iids = fields[:, 1].astype(jnp.int32)
    # mean is a frozen nn.Parameter in the reference module -> compile-time const.
    # TODO(synk): if mean must be a traced value, route it via a (1,1) SMEM input.
    mean = float(mean)

    if B < min_pallas_batch:
        # At tiny B the wrapper-side pad/gather ops dwarf the kernel; let XLA fuse.
        u = jnp.take(user_table, uids, axis=0).astype(jnp.float32)
        v = jnp.take(item_table, iids, axis=0).astype(jnp.float32)
        return jax.nn.sigmoid(jnp.sum(u * v, axis=1) + mean)

    TB = _choose_tile(_round_up(B, 8))
    nb = pl.cdiv(B, TB)
    B_pad = nb * TB
    pad = B_pad - B
    uids_p = jnp.pad(uids, (0, pad))      # padded rows gather row 0; trimmed below
    iids_p = jnp.pad(iids, (0, pad))

    # Row gather in natural (B_pad, D2) layout (no transpose pass): each kernel
    # block is a contiguous HBM slab of TB full rows.
    u_rows = jnp.take(user_table, uids_p, axis=0)     # (B_pad, D2)
    i_rows = jnp.take(item_table, iids_p, axis=0)     # (B_pad, D2)

    itemsize = jnp.dtype(user_table.dtype).itemsize
    cost = pl.CostEstimate(
        flops=2 * B_pad * D2,                         # mul + add per element
        transcendentals=B_pad,                        # sigmoid
        bytes_accessed=2 * B_pad * D2 * itemsize + B_pad * 4,
    )

    out = pl.pallas_call(
        functools.partial(mf_kernel, mean=mean),
        grid=(nb,),
        in_specs=[
            pl.BlockSpec((TB, D2), lambda b: (b, 0)),   # user rows (contiguous slab)
            pl.BlockSpec((TB, D2), lambda b: (b, 0)),   # item rows (contiguous slab)
        ],
        out_specs=pl.BlockSpec((TB, 1), lambda b: (b, 0)),
        out_shape=jax.ShapeDtypeStruct((B_pad, 1), jnp.float32),
        compiler_params=pltpu.CompilerParams(
            dimension_semantics=("parallel",),          # batch blocks independent
            vmem_limit_bytes=32 * 1024 * 1024,
        ),
        cost_estimate=cost,
    )(u_rows, i_rows)

    return out[:B, 0]


if __name__ == "__main__":
    # Small synthetic config (torchfm default embedding_size=100; use 32 here).
    num_users, num_items, D, B = 16, 24, 32, 8
    mean = 0.5

    key = jax.random.PRNGKey(0)
    k1, k2, k3, k4, k5, k6 = jax.random.split(key, 6)

    # Deterministic init matching the PyTorch __init__ ranges.
    user_emb = jax.random.uniform(k1, (num_users, D), jnp.float32, 0.0, 0.005)
    user_bias = jax.random.uniform(k2, (num_users, 1), jnp.float32, -0.01, 0.01)
    item_emb = jax.random.uniform(k3, (num_items, D), jnp.float32, 0.0, 0.005)
    item_bias = jax.random.uniform(k4, (num_items, 1), jnp.float32, -0.01, 0.01)

    u_ids = jax.random.randint(k5, (B,), 0, num_users, jnp.int32)
    i_ids = jax.random.randint(k6, (B,), 0, num_items, jnp.int32)
    fields = jnp.stack([u_ids, i_ids], axis=1)                      # (B, 2)

    # Pure-JAX reference of the original module's forward semantics.
    U = user_emb[u_ids]
    I = item_emb[i_ids]
    ref = jax.nn.sigmoid((U * I).sum(1) + user_bias[u_ids, 0]
                         + item_bias[i_ids, 0] + mean)

    # f32 tables (v5e-friendly path); force the Pallas kernel even at small B.
    U2_f32, I2_f32 = fold_bias_into_tables(user_emb, user_bias, item_emb, item_bias)
    out_f32 = mf_forward(fields, U2_f32, I2_f32, mean, min_pallas_batch=0)
    out_f32 = jax.block_until_ready(out_f32)
    assert out_f32.shape == (B,)
    assert jnp.allclose(out_f32, ref, atol=1e-6), (out_f32, ref)

    # bf16-stored tables (halves HBM traffic on v6e/v7x; kernel upcasts to f32).
    U2_bf16, I2_bf16 = fold_bias_into_tables(user_emb, user_bias, item_emb,
                                             item_bias, dtype=jnp.bfloat16)
    out_bf16 = mf_forward(fields, U2_bf16, I2_bf16, mean, min_pallas_batch=0)
    out_bf16 = jax.block_until_ready(out_bf16)
    assert out_bf16.shape == (B,)
    assert jnp.allclose(out_bf16, ref, atol=2e-3), (out_bf16, ref)

    print("KERNEL_OK")
</pallas_src>

<mosaic_0001>
module attributes {stable_mosaic.version = 11 : i64} {
  func.func @mf_kernel(%arg0: i32, %arg1: memref<8x34xf32, #tpu.memory_space<vmem>>, %arg2: memref<8x34xf32, #tpu.memory_space<vmem>>, %arg3: memref<8x1xf32, #tpu.memory_space<vmem>>) attributes {dimension_semantics = [#tpu.dimension_semantics<parallel>], iteration_bounds = array<i64: 1>, scalar_prefetch = 0 : i64, scratch_operands = 0 : i64, tpu.core_type = #tpu.core_type<tc>, window_params = [{transform_indices = @transform_0, window_bounds = array<i64: 8, 34>}, {transform_indices = @transform_1, window_bounds = array<i64: 8, 34>}, {transform_indices = @transform_2, window_bounds = array<i64: 8, 1>}]} {
    %c0 = arith.constant 0 : index
    %c0_0 = arith.constant 0 : index
    %0 = vector.load %arg1[%c0, %c0_0] : memref<8x34xf32, #tpu.memory_space<vmem>>, vector<8x34xf32>
    %c0_1 = arith.constant 0 : index
    %c0_2 = arith.constant 0 : index
    %1 = vector.load %arg2[%c0_1, %c0_2] : memref<8x34xf32, #tpu.memory_space<vmem>>, vector<8x34xf32>
    %2 = arith.mulf %0, %1 : vector<8x34xf32>
    %cst = arith.constant dense<0.000000e+00> : vector<8xf32>
    %3 = vector.multi_reduction <add>, %2, %cst [1] : vector<8x34xf32> to vector<8xf32>
    %4 = vector.shape_cast %3 : vector<8xf32> to vector<8x1xf32>
    %cst_3 = arith.constant 5.000000e-01 : f32
    %5 = vector.broadcast %cst_3 : f32 to vector<8x1xf32>
    %6 = arith.addf %4, %5 : vector<8x1xf32>
    %7 = arith.negf %6 : vector<8x1xf32>
    %8 = math.exp %7 : vector<8x1xf32>
    %cst_4 = arith.constant 1.000000e+00 : f32
    %9 = vector.broadcast %cst_4 : f32 to vector<8x1xf32>
    %10 = arith.addf %9, %8 : vector<8x1xf32>
    %11 = arith.divf %9, %10 : vector<8x1xf32>
    %c0_5 = arith.constant 0 : index
    %c0_6 = arith.constant 0 : index
    %12 = vector.load %arg3[%c0_5, %c0_6] : memref<8x1xf32, #tpu.memory_space<vmem>>, vector<8x1xf32>
    tpu.vector_store %arg3[%c0_5, %c0_6], %11 {strides = array<i32>} : memref<8x1xf32, #tpu.memory_space<vmem>>, vector<8x1xf32>,
    return
  }
  func.func @transform_0(%arg0: i32) -> (i32, i32) {
    %c0_i32 = arith.constant 0 : i32
    %c0_i32_0 = arith.constant 0 : i32
    return %arg0, %c0_i32 : i32, i32
  }
  func.func @transform_1(%arg0: i32) -> (i32, i32) {
    %c0_i32 = arith.constant 0 : i32
    %c0_i32_0 = arith.constant 0 : i32
    return %arg0, %c0_i32 : i32, i32
  }
  func.func @transform_2(%arg0: i32) -> (i32, i32) {
    %c0_i32 = arith.constant 0 : i32
    %c0_i32_0 = arith.constant 0 : i32
    return %arg0, %c0_i32 : i32, i32
  }
}

</mosaic_0001>

<bundles_post_ra>
// kernel: tpu_custom_call.1
= control target key start
LH: loop header
LB: loop body
LE: loop exit
PB: predicated region body
PF: predicated region fallthrough
CT: control target
= control target key end

     0   :  { %7 = vsyncpa [#allocation3], 0  ;;  %s156_s0 = inlined_call_operand.hbm [shape: f32[8,34], index: 0, kind: input, shape index: {}]   ;;  %s157_s1 = inlined_call_operand.hbm [shape: f32[8,34], index: 1, kind: input, shape index: {}]   ;;  %s158_s2 = inlined_call_operand.vmem [shape: f32[8,1], index: 2, kind: output, shape index: {}]  }
   0x1   :  { %8 = vsyncpa [#allocation5], 0  ;;  %s112_s9 = smov [#allocation2]   ;;  %s113_s11 = smov [#allocation4]  }
   0x2   :  { %s15_s10 = sshll.u32 %s112_s9, 4  ;;  %s25_s12 = sshll.u32 %s113_s11, 4  ;;  %s16_s10 = int_to_ptr.vmem [resolvable:$true] %s15_s10  ;;  %s26_s12 = int_to_ptr.vmem [resolvable:$true] %s25_s12 }
   0x3   :  { %s64_s15 = scalar_lea.hbm %s156_s0, 128 }
   0x4   :  { %p65_p0 = scmp.ne.s32.totalorder %s156_s0, %s64_s15  ;;  %p68_p1 = scmp.lt.u32.totalorder %s64_s15, %s156_s0 }
   0x6   :  { %p70_p2 = pnand %p68_p1, %p65_p0 }
   0x8   :  { %73 = shalt.err (!%p70_p2)
}
   0x9   :  { %s74_s20 = scalar_lea.vmem %s16_s10, 128  ;;  %p79_p4 = scmp.lt.s32.totalorder %s16_s10, %s16_s10 }
   0xa   :  { %p75_p3 = scmp.ne.s32.totalorder %s16_s10, %s74_s20  ;;  %p80_p5 = scmp.lt.s32.totalorder %s74_s20, %s74_s20 }
   0xc   :  { %p81_p6 = por %p80_p5, %p79_p4 }
   0xe   :  { %p82_p7 = pnand %p81_p6, %p75_p3 }
  0x10   :  { %85 = shalt.err (!%p82_p7)
}
  0x11   :  { %18 = dma.hbm_to_vmem [thread:$0]  %s156_s0, 128, %s16_s10, [#allocation3]  }
  0x12   :  { %s86_s25 = scalar_lea.hbm %s157_s1, 128 }
  0x13   :  { %p87_p8 = scmp.ne.s32.totalorder %s157_s1, %s86_s25  ;;  %p90_p9 = scmp.lt.u32.totalorder %s86_s25, %s157_s1 }
  0x15   :  { %p92_p10 = pnand %p90_p9, %p87_p8 }
  0x17   :  { %95 = shalt.err (!%p92_p10)
}
  0x18   :  { %s96_s30 = scalar_lea.vmem %s26_s12, 128  ;;  %p101_p12 = scmp.lt.s32.totalorder %s26_s12, %s26_s12 }
  0x19   :  { %p97_p11 = scmp.ne.s32.totalorder %s26_s12, %s96_s30  ;;  %p102_p13 = scmp.lt.s32.totalorder %s96_s30, %s96_s30 }
  0x1b   :  { %p103_p0 = por %p102_p13, %p101_p12 }
  0x1d   :  { %p104_p1 = pnand %p103_p0, %p97_p11 }
  0x1f   :  { %107 = shalt.err (!%p104_p1)
}
  0x20   :  { %28 = dma.hbm_to_vmem [thread:$0]  %s157_s1, 128, %s26_s12, [#allocation5]  }
  0x21   :  { %108 = dma.done.wait [#allocation3], 128  }
  0x22   :  { %109 = vsyncadd [#allocation3], 4294967168 }
  0x23   :  { %110 = dma.done.wait [#allocation5], 128  }
  0x24   :  { %111 = vsyncadd [#allocation5], 4294967168  ;;  %v35_v0 = vld [vmem:[#allocation2] sm:$0xff]  ;;  %v36_v1 = vld [vmem:[#allocation4] sm:$0xff]  ;;  %vm38_vm0 = vcmask 277504   ;;  %vm49_vm1 = vcmask 7168  }
  0x25   :  { %v37_v2 = vmul.f32 %v36_v1, %v35_v0 }
  0x27   :  { %v39_v3 = vsel %vm38_vm0, %v37_v2, 0.0 }
  0x28   :  { %40 = vadd.xlane.f32.xlu0 %v39_v3 }
  0xb5   :  { %v41_v4 = vpop.xlane.xlu0 %40 }
  0xb6   :  { %v42_v5 = vadd.f32 0.5, %v41_v4 }
  0xb8   :  { %v57_v6 = vmul.f32 -1.442695, %v42_v5 }
  0xba   :  { %60 = vpow2.f32 %v57_v6 }
  0xc4   :  { %v61_v7 = vpop.eup %60 }
  0xc5   :  { %v46_v8 = vadd.f32 1.0, %v61_v7 }
  0xc7   :  { %62 = vrcp.f32 %v46_v8 }
  0xd1   :  { %v63_v9 = vpop.eup %62 }
  0xd2   :  { %50 = vst.msk [vmem:[%s158_s2] sm:$0xff] %vm49_vm1, %v63_v9 }
  0xd3   :  { %55 = vsyncpa [#allocation3], 1 }
  0xd4   :  { %56 = vsyncpa [#allocation5], 1 }

</bundles_post_ra>
